<compile_context>
chip_gen: v6e
topology: v6e:2x2x1
jax: 0.10.0
libtpu: 0.0.40
codegen_flags: <defaults>
</compile_context>

<pallas_src>
import math

import jax
import jax.numpy as jnp
from jax import lax
from jax.experimental import pallas as pl
from jax.experimental.pallas import tpu as pltpu


def classifier_kernel(x_ref, w_ref, b_ref, o_ref, acc_ref):
    """Streaming spatial sum -> (finalize) lane-reduce + fused projection.

    x_ref   : [TB*C, THW]  image tile (native dtype), HW on the lane axis
    w_ref   : [C, NP]      fused (enc @ head.T) / (H*W), class dim padded to 128
    b_ref   : [1, NP]      fused bias, padded
    o_ref   : [TB, NP]     padded logits
    acc_ref : [TB*C, 128]  f32 per-lane-group partial-sum accumulator (VMEM)
    """
    hw = pl.program_id(1)

    @pl.when(hw == 0)
    def _init():
        acc_ref[...] = jnp.zeros_like(acc_ref)

    # --- hot loop: dense, lane-aligned 128-wide loads + VPU adds only.
    #     The cross-lane (XLU) reduction is deferred to the finalize step, and
    #     the tile is never materialized as a full f32 copy.
    n_chunks = x_ref.shape[-1] // 128
    partial = x_ref[:, pl.ds(0, 128)].astype(jnp.float32)
    if n_chunks <= 8:
        # Small tile: fully unrolled at trace time.
        for j in range(1, n_chunks):
            partial = partial + x_ref[:, pl.ds(j * 128, 128)]
    else:
        # Large tile: bounded unroll keeps code size / live ranges in check.
        def body(j, p):
            off = pl.multiple_of(j * 128, 128)
            return p + x_ref[:, pl.ds(off, 128)]
        partial = lax.fori_loop(1, n_chunks, body, partial, unroll=8)
    acc_ref[...] += partial

    @pl.when(hw == pl.num_programs(1) - 1)
    def _finalize():
        rows = acc_ref.shape[0]
        tb = o_ref.shape[0]
        c = rows // tb
        w = w_ref[...]                                   # [C, NP]
        bias = b_ref[...]                                # [1, NP]
        # Tiny per-batch-row epilogue (static ref slices only, no reshapes):
        #   pooled[c] = sum_lanes acc[row, :];  logits = pooled @ w + bias
        for t in range(tb):
            pooled_t = jnp.sum(acc_ref[pl.ds(t * c, c), :],
                               axis=-1, keepdims=True)   # [C, 1]
            logit_t = jnp.sum(pooled_t * w, axis=0, keepdims=True) + bias
            o_ref[pl.ds(t, 1), :] = logit_t.astype(o_ref.dtype)


def _pick_batch_tile(B, max_tb=32):
    """Batch-tile size TB.

    Constraints: TB divides B; the (TB, 128k) output block needs TB % 8 == 0
    or TB == B (sublane tiling).  Preference: leave B // TB >= 2 batch tiles
    so the "parallel" grid axis can shard across v7x's two TensorCores.
    """
    cands = [d for d in range(8, B, 8) if B % d == 0 and d <= max_tb]
    return max(cands) if cands else B


def _pick_hw_tile(hw, rows, itemsize, max_tile_bytes=8 << 20):
    """Return (THW, HW_pad): lane-aligned spatial tile and padded extent.

    THW is a multiple of 128 sized so one (rows, THW) tile stays within the
    per-buffer budget (the pipeline double-buffers it).  Prefer a THW that
    divides the 128-rounded HW (minimal zero padding); otherwise pad HW up to
    a multiple of a budget-sized tile (zeros are neutral for the sum).
    """
    hw128 = pl.cdiv(hw, 128) * 128
    t_max = (max_tile_bytes // (rows * itemsize)) // 128 * 128
    t_max = max(128, min(t_max, hw128))
    t_div = max(t for t in range(128, t_max + 1, 128) if hw128 % t == 0)
    if 2 * t_div >= t_max:
        return t_div, hw128
    return t_max, pl.cdiv(hw, t_max) * t_max


def classifier_forward(x_nchw, w_enc, b_enc, w_head, b_head, *, hw_tile=None):
    """x_nchw: [B, C, H, W] -> logits [B, num_classes]."""
    B, C, H, W = x_nchw.shape
    HW = H * W
    num_classes = w_head.shape[0]
    itemsize = jnp.dtype(x_nchw.dtype).itemsize   # stream native dtype; no cast

    # ---- tiling: batch tiles (parallel) x spatial tiles (reduction, last).
    TB = _pick_batch_tile(B)
    rows = TB * C
    if hw_tile is None:
        THW, HW_pad = _pick_hw_tile(HW, rows, itemsize)
    else:
        assert hw_tile % 128 == 0
        THW = hw_tile
        HW_pad = pl.cdiv(HW, THW) * THW
    grid = (B // TB, HW_pad // THW)

    # ---- layout: [B*C, HW] (free reshape, channels packed onto sublanes);
    #      zero-pad the lane axis only if HW is not already tile-aligned.
    x_flat = x_nchw.reshape(B * C, HW)
    if HW_pad != HW:
        x_flat = jnp.pad(x_flat, ((0, 0), (0, HW_pad - HW)))

    # ---- algebraic fusion of stand-in encoder projection + classification
    #      head, with the 1/(H*W) pooling scale folded into the weight.
    w_fused = (w_enc @ w_head.T) / float(HW)          # [C, num_classes]
    b_fused = b_enc @ w_head.T + b_head               # [num_classes]

    # ---- lane-dense padding of the class dimension (sliced back afterwards).
    NP = max(128, pl.cdiv(num_classes, 128) * 128)
    w_pad = jnp.zeros((C, NP), jnp.float32).at[:, :num_classes].set(
        w_fused.astype(jnp.float32))
    b_pad = jnp.zeros((1, NP), jnp.float32).at[:, :num_classes].set(
        b_fused.astype(jnp.float32))

    out = pl.pallas_call(
        classifier_kernel,
        out_shape=jax.ShapeDtypeStruct((B, NP), jnp.float32),
        grid_spec=pltpu.PrefetchScalarGridSpec(
            num_scalar_prefetch=0,
            grid=grid,
            in_specs=[
                pl.BlockSpec((rows, THW), lambda b, h: (b, h)),
                pl.BlockSpec((C, NP), lambda b, h: (0, 0)),
                pl.BlockSpec((1, NP), lambda b, h: (0, 0)),
            ],
            out_specs=pl.BlockSpec((TB, NP), lambda b, h: (b, 0)),
            scratch_shapes=[pltpu.VMEM((rows, 128), jnp.float32)],
        ),
        compiler_params=pltpu.CompilerParams(
            dimension_semantics=("parallel", "arbitrary"),
            # 2 x 8 MiB double-buffered input + tiny extras; 48 MiB leaves
            # headroom under v7x's 64 MiB VMEM and is comfortable on v5e/v6e.
            vmem_limit_bytes=48 * 1024 * 1024,
        ),
    )(x_flat, w_pad, b_pad)

    return out[:, :num_classes]


def init_params(key, in_channels, embedding_size, num_classes):
    k_enc, k_head = jax.random.split(key, 2)

    # Stand-in encoder projection: deterministic normal init.
    w_enc = jax.random.normal(k_enc, (in_channels, embedding_size),
                              dtype=jnp.float32) * (1.0 / math.sqrt(in_channels))
    b_enc = jnp.zeros((embedding_size,), dtype=jnp.float32)

    # classification_head: nn.Linear(embedding_size, num_classes)
    #   kaiming_normal_(weight, mode='fan_out') -> std = sqrt(2 / fan_out)
    #   constant_(bias, 0)
    std = math.sqrt(2.0 / num_classes)
    w_head = jax.random.normal(k_head, (num_classes, embedding_size),
                               dtype=jnp.float32) * std   # PyTorch layout [out, in]
    b_head = jnp.zeros((num_classes,), dtype=jnp.float32)
    return w_enc, b_enc, w_head, b_head


if __name__ == "__main__":
    key = jax.random.PRNGKey(0)
    k_x, k_x2, k_x3, k_p = jax.random.split(key, 4)

    B, C, H, W = 2, 4, 16, 16
    embedding_size = 32
    num_classes = 2

    x = jax.random.normal(k_x, (B, C, H, W), dtype=jnp.float32)
    w_enc, b_enc, w_head, b_head = init_params(k_p, C, embedding_size, num_classes)

    def reference(xin):
        b, c, h, w = xin.shape
        pooled = jnp.mean(xin.reshape(b, c, h * w), axis=-1)   # pure f32 path
        return (pooled @ w_enc + b_enc) @ w_head.T + b_head

    # 1) default (largest-fitting) spatial tile.
    logits = classifier_forward(x, w_enc, b_enc, w_head, b_head)
    jax.block_until_ready(logits)
    assert jnp.allclose(logits, reference(x), atol=1e-3, rtol=1e-3)

    # 2) forced smaller spatial tile -> exercises the multi-step reduction.
    logits_t = classifier_forward(x, w_enc, b_enc, w_head, b_head, hw_tile=128)
    jax.block_until_ready(logits_t)
    assert jnp.allclose(logits_t, reference(x), atol=1e-3, rtol=1e-3)

    # 3) larger batch -> exercises the parallel batch-tile axis (TB=8, 2 tiles).
    x2 = jax.random.normal(k_x2, (16, C, H, W), dtype=jnp.float32)
    logits2 = classifier_forward(x2, w_enc, b_enc, w_head, b_head)
    jax.block_until_ready(logits2)
    assert jnp.allclose(logits2, reference(x2), atol=1e-3, rtol=1e-3)

    # 4) H*W not a multiple of 128 -> exercises the zero-pad path.
    x3 = jax.random.normal(k_x3, (B, C, 10, 10), dtype=jnp.float32)
    logits3 = classifier_forward(x3, w_enc, b_enc, w_head, b_head)
    jax.block_until_ready(logits3)
    assert jnp.allclose(logits3, reference(x3), atol=1e-3, rtol=1e-3)

    print("KERNEL_OK")
</pallas_src>

<mosaic_0001>
module attributes {stable_mosaic.version = 11 : i64} {
  func.func @classifier_kernel(%arg0: i32, %arg1: i32, %arg2: memref<8x256xf32, #tpu.memory_space<vmem>>, %arg3: memref<4x128xf32, #tpu.memory_space<vmem>>, %arg4: memref<1x128xf32, #tpu.memory_space<vmem>>, %arg5: memref<2x128xf32, #tpu.memory_space<vmem>>, %arg6: memref<8x128xf32, #tpu.memory_space<vmem>>) attributes {dimension_semantics = [#tpu.dimension_semantics<parallel>, #tpu.dimension_semantics<arbitrary>], iteration_bounds = array<i64: 1, 1>, scalar_prefetch = 0 : i64, scratch_operands = 1 : i64, tpu.core_type = #tpu.core_type<tc>, window_params = [{transform_indices = @transform_0, window_bounds = array<i64: 8, 256>}, {pipeline_mode = #tpu.pipeline_mode<synchronous>, transform_indices = @transform_1, window_bounds = array<i64: 4, 128>}, {pipeline_mode = #tpu.pipeline_mode<synchronous>, transform_indices = @transform_2, window_bounds = array<i64: 1, 128>}, {transform_indices = @transform_3, window_bounds = array<i64: 2, 128>}]} {
    %c0_i32 = arith.constant 0 : i32
    %0 = arith.cmpi eq, %arg1, %c0_i32 : i32
    %1 = arith.extui %0 : i1 to i32
    %c0_i32_0 = arith.constant 0 : i32
    %2 = arith.cmpi ne, %1, %c0_i32_0 : i32
    scf.if %2 {
      %cst = arith.constant 0.000000e+00 : f32
      %12 = vector.broadcast %cst : f32 to vector<8x128xf32>
      %c0_9 = arith.constant 0 : index
      %c0_10 = arith.constant 0 : index
      %13 = vector.load %arg6[%c0_9, %c0_10] : memref<8x128xf32, #tpu.memory_space<vmem>>, vector<8x128xf32>
      tpu.vector_store %arg6[%c0_9, %c0_10], %12 {strides = array<i32>} : memref<8x128xf32, #tpu.memory_space<vmem>>, vector<8x128xf32>,
    } else {
    }
    %c0 = arith.constant 0 : index
    %c0_1 = arith.constant 0 : index
    %3 = vector.load %arg2[%c0, %c0_1] : memref<8x256xf32, #tpu.memory_space<vmem>>, vector<8x128xf32>
    %c0_2 = arith.constant 0 : index
    %c128 = arith.constant 128 : index
    %4 = vector.load %arg2[%c0_2, %c128] : memref<8x256xf32, #tpu.memory_space<vmem>>, vector<8x128xf32>
    %5 = arith.addf %3, %4 : vector<8x128xf32>
    %c0_3 = arith.constant 0 : index
    %c0_4 = arith.constant 0 : index
    %6 = vector.load %arg6[%c0_3, %c0_4] : memref<8x128xf32, #tpu.memory_space<vmem>>, vector<8x128xf32>
    %7 = arith.addf %6, %5 : vector<8x128xf32>
    %c0_5 = arith.constant 0 : index
    %c0_6 = arith.constant 0 : index
    %8 = vector.load %arg6[%c0_5, %c0_6] : memref<8x128xf32, #tpu.memory_space<vmem>>, vector<8x128xf32>
    tpu.vector_store %arg6[%c0_5, %c0_6], %7 {strides = array<i32>} : memref<8x128xf32, #tpu.memory_space<vmem>>, vector<8x128xf32>,
    %c0_i32_7 = arith.constant 0 : i32
    %9 = arith.cmpi eq, %arg1, %c0_i32_7 : i32
    %10 = arith.extui %9 : i1 to i32
    %c0_i32_8 = arith.constant 0 : i32
    %11 = arith.cmpi ne, %10, %c0_i32_8 : i32
    scf.if %11 {
      %c0_9 = arith.constant 0 : index
      %c0_10 = arith.constant 0 : index
      %12 = vector.load %arg3[%c0_9, %c0_10] : memref<4x128xf32, #tpu.memory_space<vmem>>, vector<4x128xf32>
      %c0_11 = arith.constant 0 : index
      %c0_12 = arith.constant 0 : index
      %13 = vector.load %arg4[%c0_11, %c0_12] : memref<1x128xf32, #tpu.memory_space<vmem>>, vector<1x128xf32>
      %c0_13 = arith.constant 0 : index
      %c0_14 = arith.constant 0 : index
      %14 = vector.load %arg6[%c0_13, %c0_14] : memref<8x128xf32, #tpu.memory_space<vmem>>, vector<4x128xf32>
      %cst = arith.constant dense<0.000000e+00> : vector<4xf32>
      %15 = vector.multi_reduction <add>, %14, %cst [1] : vector<4x128xf32> to vector<4xf32>
      %16 = vector.shape_cast %15 : vector<4xf32> to vector<4x1xf32>
      %17 = vector.broadcast %16 : vector<4x1xf32> to vector<4x128xf32>
      %18 = arith.mulf %17, %12 : vector<4x128xf32>
      %cst_15 = arith.constant dense<0.000000e+00> : vector<128xf32>
      %19 = vector.multi_reduction <add>, %18, %cst_15 [0] : vector<4x128xf32> to vector<128xf32>
      %20 = vector.shape_cast %19 : vector<128xf32> to vector<1x128xf32>
      %21 = arith.addf %20, %13 : vector<1x128xf32>
      %c0_16 = arith.constant 0 : index
      %c0_17 = arith.constant 0 : index
      %22 = vector.load %arg5[%c0_16, %c0_17] : memref<2x128xf32, #tpu.memory_space<vmem>>, vector<1x128xf32>
      tpu.vector_store %arg5[%c0_16, %c0_17], %21 {strides = array<i32>} : memref<2x128xf32, #tpu.memory_space<vmem>>, vector<1x128xf32>,
      %c4 = arith.constant 4 : index
      %c0_18 = arith.constant 0 : index
      %23 = vector.load %arg6[%c4, %c0_18] : memref<8x128xf32, #tpu.memory_space<vmem>>, vector<4x128xf32>
      %cst_19 = arith.constant dense<0.000000e+00> : vector<4xf32>
      %24 = vector.multi_reduction <add>, %23, %cst_19 [1] : vector<4x128xf32> to vector<4xf32>
      %25 = vector.shape_cast %24 : vector<4xf32> to vector<4x1xf32>
      %26 = vector.broadcast %25 : vector<4x1xf32> to vector<4x128xf32>
      %27 = arith.mulf %26, %12 : vector<4x128xf32>
      %cst_20 = arith.constant dense<0.000000e+00> : vector<128xf32>
      %28 = vector.multi_reduction <add>, %27, %cst_20 [0] : vector<4x128xf32> to vector<128xf32>
      %29 = vector.shape_cast %28 : vector<128xf32> to vector<1x128xf32>
      %30 = arith.addf %29, %13 : vector<1x128xf32>
      %c1 = arith.constant 1 : index
      %c0_21 = arith.constant 0 : index
      %31 = vector.load %arg5[%c1, %c0_21] : memref<2x128xf32, #tpu.memory_space<vmem>>, vector<1x128xf32>
      tpu.vector_store %arg5[%c1, %c0_21], %30 {strides = array<i32>} : memref<2x128xf32, #tpu.memory_space<vmem>>, vector<1x128xf32>,
    } else {
    }
    return
  }
  func.func @transform_0(%arg0: i32, %arg1: i32) -> (i32, i32) {
    %c0_i32 = arith.constant 0 : i32
    return %arg0, %arg1 : i32, i32
  }
  func.func @transform_1(%arg0: i32, %arg1: i32) -> (i32, i32) {
    %c0_i32 = arith.constant 0 : i32
    %c0_i32_0 = arith.constant 0 : i32
    %c0_i32_1 = arith.constant 0 : i32
    return %c0_i32, %c0_i32_0 : i32, i32
  }
  func.func @transform_2(%arg0: i32, %arg1: i32) -> (i32, i32) {
    %c0_i32 = arith.constant 0 : i32
    %c0_i32_0 = arith.constant 0 : i32
    %c0_i32_1 = arith.constant 0 : i32
    return %c0_i32, %c0_i32_0 : i32, i32
  }
  func.func @transform_3(%arg0: i32, %arg1: i32) -> (i32, i32) {
    %c0_i32 = arith.constant 0 : i32
    %c0_i32_0 = arith.constant 0 : i32
    return %arg0, %c0_i32 : i32, i32
  }
}

</mosaic_0001>

<bundles_post_ra>
// kernel: tpu_custom_call.1
= control target key start
LH: loop header
LB: loop body
LE: loop exit
PB: predicated region body
PF: predicated region fallthrough
CT: control target
= control target key end

     0   :  { %8 = vsyncpa [#allocation4], 0  ;;  %s205_s0 = inlined_call_operand.hbm [shape: f32[8,256], index: 0, kind: input, shape index: {}]   ;;  %s206_s1 = inlined_call_operand.hbm [shape: f32[4,128], index: 1, kind: input, shape index: {}]   ;;  %s207_s2 = inlined_call_operand.vmem [shape: f32[1,128], index: 2, kind: input, shape index: {}]   ;;  %s208_s3 = inlined_call_operand.hbm [shape: f32[2,128], index: 3, kind: output, shape index: {}]  }
   0x1   :  { %9 = vsyncpa [#allocation7], 0 }
   0x2   :  { %10 = vsyncpa [#allocation5], 0  ;;  %s170_s12 = smov [#allocation3]   ;;  %s171_s14 = smov [#allocation6]  }
   0x3   :  { %s17_s13 = sshll.u32 %s170_s12, 4  ;;  %s27_s15 = sshll.u32 %s171_s14, 4  ;;  %s18_s13 = int_to_ptr.vmem [resolvable:$true] %s17_s13  ;;  %s28_s15 = int_to_ptr.vmem [resolvable:$true] %s27_s15 }
   0x4   :  { %s112_s16 = scalar_lea.vmem %s18_s13, 256  ;;  %p117_p1 = scmp.lt.s32.totalorder %s18_s13, %s18_s13 }
   0x5   :  { %p113_p0 = scmp.ne.s32.totalorder %s18_s13, %s112_s16  ;;  %p118_p2 = scmp.lt.s32.totalorder %s112_s16, %s112_s16 }
   0x7   :  { %p119_p3 = por %p118_p2, %p117_p1 }
   0x9   :  { %p120_p4 = pnand %p119_p3, %p113_p0 }
   0xb   :  { %123 = shalt.err (!%p120_p4)
}
   0xc   :  { %20 = dma.hbm_to_vmem [thread:$0]  %s205_s0, 256, %s18_s13, [#allocation4]  }
   0xd   :  { %s132_s19 = scalar_lea.vmem %s28_s15, 64  ;;  %p137_p6 = scmp.lt.s32.totalorder %s28_s15, %s28_s15 }
   0xe   :  { %p133_p5 = scmp.ne.s32.totalorder %s28_s15, %s132_s19  ;;  %p138_p7 = scmp.lt.s32.totalorder %s132_s19, %s132_s19 }
  0x10   :  { %p139_p8 = por %p138_p7, %p137_p6 }
  0x12   :  { %p140_p9 = pnand %p139_p8, %p133_p5 }
  0x14   :  { %143 = shalt.err (!%p140_p9)
}
  0x15   :  { %30 = dma.hbm_to_vmem [thread:$0]  %s206_s1, 64, %s28_s15, [#allocation7]  }
  0x16   :  { %164 = dma.done.wait [#allocation4], 256  }
  0x17   :  { %165 = vsyncadd [#allocation4], 4294967040 }
  0x18   :  { %166 = dma.done.wait [#allocation7], 64  }
  0x19   :  { %167 = vsyncadd [#allocation7], 4294967232  ;;  %v44_v0 = vld [vmem:[#allocation3] sm:$0xff]  ;;  %v45_v1 = vld [vmem:[#allocation3 + $0x8] sm:$0xff]  ;;  %vm56_vm0 = vcmask 1043456   ;;  %s172_s22 = smov [#allocation8]  }
  0x1a   :  { %v46_v2 = vadd.f32 %v45_v1, %v44_v0  ;;  %v53_v7 = vld [vmem:[#allocation6] sm:$0xf]  ;;  %v54_v22 = vld [vmem:[%s207_s2] sm:$0x1]  ;;  %s90_s23 = sshll.u32 %s172_s22, 4  ;;  %s91_s23 = int_to_ptr.vmem [resolvable:$true] %s90_s23 }
  0x1b   :  { %s144_s24 = scalar_lea.vmem %s91_s23, 32  ;;  %p149_p11 = scmp.lt.s32.totalorder %s91_s23, %s91_s23 }
  0x1c   :  { %49 = vst [vmem:[#allocation2] sm:$0xff] %v46_v2  ;;  %p145_p10 = scmp.ne.s32.totalorder %s91_s23, %s144_s24  ;;  %p150_p12 = scmp.lt.s32.totalorder %s144_s24, %s144_s24 }
  0x1e   :  { %p151_p13 = por %p150_p12, %p149_p11 }
  0x20   :  { %p152_p0 = pnand %p151_p13, %p145_p10 }
  0x23   :  { %v55_v3 = vld [vmem:[#allocation2] sm:$0xf]  ;;  %v70_v4 = vld [vmem:[#allocation2 + $0x4] sm:$0xf] }
  0x24   :  { %v57_v5 = vsel %vm56_vm0, %v55_v3, 0.0  ;;  %v71_v6 = vsel %vm56_vm0, %v70_v4, 0.0 }
  0x25   :  { %58 = vadd.xlane.f32.xlu0 %v57_v5 }
  0x29   :  { %72 = vadd.xlane.f32.xlu0 %v71_v6 }
  0xae   :  { %v59_v8 = vpop.xlane.xlu0 %58 }
  0xaf   :  { %v60_v9 = vmul.f32 %v59_v8, %v53_v7 }
  0xb1   :  { %v61_v10 = vsel %vm56_vm0, %v60_v9, 0.0 }
  0xb2   :  { %v62_v11 = vrot.slane %v61_v10, 4  ;;  %v73_v12 = vpop.xlane.xlu0 %72 }
  0xb3   :  { %v74_v13 = vmul.f32 %v73_v12, %v53_v7 }
  0xb4   :  { %v63_v14 = vadd.f32 %v62_v11, %v61_v10 }
  0xb5   :  { %v75_v15 = vsel %vm56_vm0, %v74_v13, 0.0 }
  0xb6   :  { %v64_v16 = vrot.slane %v63_v14, 2  ;;  %v76_v17 = vrot.slane %v75_v15, 4 }
  0xb8   :  { %v65_v18 = vadd.f32 %v64_v16, %v63_v14  ;;  %v77_v19 = vadd.f32 %v76_v17, %v75_v15 }
  0xba   :  { %v66_v20 = vrot.slane %v65_v18, 1  ;;  %v78_v21 = vrot.slane %v77_v19, 2 }
  0xbc   :  { %v79_v23 = vadd.f32 %v78_v21, %v77_v19  ;;  %v67_v24 = vadd.f32 %v66_v20, %v65_v18 }
  0xbe   :  { %v80_v25 = vrot.slane %v79_v23, 1  ;;  %v68_v26 = vadd.f32 %v67_v24, %v54_v22 }
  0xc0   :  { %69 = vst [vmem:[#allocation8] sm:$0x1] %v68_v26  ;;  %v81_v27 = vadd.f32 %v80_v25, %v79_v23 }
  0xc2   :  { %v82_v28 = vadd.f32 %v81_v27, %v54_v22 }
  0xc4   :  { %83 = vst [vmem:[#allocation8 + $0x1] sm:$0x1] %v82_v28 }
  0xc5   :  { %155 = shalt.err (!%p152_p0)
}
  0xc6   :  { %93 = dma.vmem_to_hbm [thread:$0]  %s91_s23, 32, %s208_s3, [#allocation5]  }
  0xc7   :  { %168 = dma.done.wait [#allocation5], 32  }
  0xc8   :  { %169 = vsyncadd [#allocation5], 4294967264 }
  0xc9   :  { %97 = vsyncpa [#allocation4], 1 }
  0xca   :  { %98 = vsyncpa [#allocation7], 1 }
  0xcb   :  { %99 = vsyncpa [#allocation5], 1 }

</bundles_post_ra>
